<compile_context>
chip_gen: v7x
topology: tpu7x:2x2x1
jax: 0.10.0
libtpu: 0.0.40
codegen_flags: <defaults>
</compile_context>

<pallas_src>
import functools

import jax
import jax.numpy as jnp
from jax.experimental import pallas as pl
from jax.experimental.pallas import tpu as pltpu


def _round_up(a, b):
    return ((a + b - 1) // b) * b


def _ls_ce_kernel(x_ref, tgt_ref, out_ref, *, smoothing, num_classes, n_valid, tile_n):
    """One (tile_n, C) row-tile -> a single per-tile partial loss sum."""
    i = pl.program_id(0)

    x = x_ref[...].astype(jnp.float32)      # (tile_n, C); no-op cast for f32 logits
    tgt = tgt_ref[...]                      # (tile_n, 1) int32

    # logsumexp over the class (lane) axis.
    m = jnp.max(x, axis=-1, keepdims=True)                        # (tile_n, 1)
    s = jnp.sum(jnp.exp(x - m), axis=-1, keepdims=True)           # (tile_n, 1)
    lse = m + jnp.log(s)                                          # (tile_n, 1)

    # Fused weighted sweep over x:
    #   confidence*nll + smoothing*smooth
    #     = lse - confidence*x_tgt - (smoothing/C)*sum_x
    #     = lse - sum_j w_j * x_j,   w_j = confidence*[j==tgt] + smoothing/C
    confidence = 1.0 - smoothing
    w_smooth = smoothing / num_classes
    col = jax.lax.broadcasted_iota(jnp.int32, x.shape, 1)         # (tile_n, C)
    w = jnp.where(col == tgt, confidence + w_smooth, w_smooth)    # (tile_n, C)
    wx = jnp.sum(w * x, axis=-1, keepdims=True)                   # (tile_n, 1)

    loss = lse - wx                                               # (tile_n, 1)

    # Zero rows past the true N (ragged / padded last tile) so the outside
    # sum / true-N is exact.  The mask iota is only (tile_n, 1) -- negligible.
    row = jax.lax.broadcasted_iota(jnp.int32, loss.shape, 0) + i * tile_n
    loss = jnp.where(row < n_valid, loss, 0.0)

    # One scalar partial per tile: no lane-1 per-row HBM writeback.
    out_ref[...] = jnp.sum(loss, keepdims=True)                   # (1, 1)


def label_smoothing_cross_entropy(x, target, smoothing=0.01, tile_n=None):
    """x: (N, C) logits, target: (N,) int class ids -> scalar mean loss (f32)."""
    n, c = x.shape

    if tile_n is None:
        # Size the row tile from a byte budget (not a fixed row cap): target ~4 MiB
        # input blocks so the pipeline runs near the HBM roofline on every generation
        # while 2x double-buffered input + f32 temporaries stay under scoped VMEM.
        bytes_per_row = c * x.dtype.itemsize
        block_bytes = 4 * 1024 * 1024
        tile_n = max(8, block_bytes // max(1, bytes_per_row))
    tile_n = max(8, (tile_n // 8) * 8)          # sublane-aligned
    tile_n = min(tile_n, _round_up(n, 8))       # don't over-pad tiny batches
    n_pad = _round_up(n, tile_n)
    num_tiles = n_pad // tile_n

    xp = x if n_pad == n else jnp.pad(x, ((0, n_pad - n), (0, 0)))
    tgt2 = target.astype(jnp.int32).reshape(n, 1)
    if n_pad != n:
        tgt2 = jnp.pad(tgt2, ((0, n_pad - n), (0, 0)))

    per_tile = pl.pallas_call(
        functools.partial(
            _ls_ce_kernel,
            smoothing=float(smoothing),
            num_classes=c,
            n_valid=n,
            tile_n=tile_n,
        ),
        out_shape=jax.ShapeDtypeStruct((num_tiles, 1), jnp.float32),
        grid=(num_tiles,),
        in_specs=[
            pl.BlockSpec((tile_n, c), lambda i: (i, 0)),
            pl.BlockSpec((tile_n, 1), lambda i: (i, 0)),
        ],
        out_specs=pl.BlockSpec((1, 1), lambda i: (i, 0)),
        compiler_params=pltpu.CompilerParams(
            dimension_semantics=("parallel",),
            vmem_limit_bytes=48 * 1024 * 1024,
        ),
    )(xp, tgt2)

    # Tiny final reduction; single divide by the true N (padded rows contribute 0).
    return jnp.sum(per_tile) / jnp.float32(n)


def _reference(x, target, smoothing=0.01):
    confidence = 1.0 - smoothing
    logprobs = jax.nn.log_softmax(x.astype(jnp.float32), axis=-1)
    nll = -jnp.take_along_axis(logprobs, target[:, None].astype(jnp.int32), axis=-1)[:, 0]
    smooth = -jnp.mean(logprobs, axis=-1)
    return jnp.mean(confidence * nll + smoothing * smooth)


if __name__ == "__main__":
    key = jax.random.PRNGKey(0)
    kx, kt = jax.random.split(key)

    # Small demo shape consistent with the module: batch of 8 samples, 32 classes.
    N, C = 8, 32
    x = jax.random.normal(kx, (N, C), dtype=jnp.float32)
    target = jax.random.randint(kt, (N,), 0, C, dtype=jnp.int32)

    loss = jax.block_until_ready(label_smoothing_cross_entropy(x, target, smoothing=0.01))
    ref = _reference(x, target, smoothing=0.01)
    assert jnp.allclose(loss, ref, atol=1e-5, rtol=1e-5), (loss, ref)

    # Multi-tile + ragged last tile (exercises the grid, masking, per-tile partials).
    N2, C2 = 300, 32
    x2 = jax.random.normal(kx, (N2, C2), dtype=jnp.float32)
    t2 = jax.random.randint(kt, (N2,), 0, C2, dtype=jnp.int32)
    loss2 = jax.block_until_ready(
        label_smoothing_cross_entropy(x2, t2, smoothing=0.01, tile_n=128)
    )
    ref2 = _reference(x2, t2, smoothing=0.01)
    assert jnp.allclose(loss2, ref2, atol=1e-5, rtol=1e-5), (loss2, ref2)

    # C not a multiple of 128 (review correctness concern): padded lanes must be
    # excluded from the max/sum reductions.
    N3, C3 = 50, 100
    x3 = jax.random.normal(kx, (N3, C3), dtype=jnp.float32)
    t3 = jax.random.randint(kt, (N3,), 0, C3, dtype=jnp.int32)
    loss3 = jax.block_until_ready(label_smoothing_cross_entropy(x3, t3, smoothing=0.01))
    ref3 = _reference(x3, t3, smoothing=0.01)
    assert jnp.allclose(loss3, ref3, atol=1e-5, rtol=1e-5), (loss3, ref3)

    print("KERNEL_OK")
</pallas_src>

<mosaic_0001>
module attributes {stable_mosaic.version = 11 : i64} {
  func.func @_ls_ce_kernel(%arg0: i32, %arg1: memref<8x32xf32, #tpu.memory_space<vmem>>, %arg2: memref<8x1xi32, #tpu.memory_space<vmem>>, %arg3: memref<1x1xf32, #tpu.memory_space<vmem>>) attributes {dimension_semantics = [#tpu.dimension_semantics<parallel>], iteration_bounds = array<i64: 1>, scalar_prefetch = 0 : i64, scratch_operands = 0 : i64, tpu.core_type = #tpu.core_type<tc>, window_params = [{transform_indices = @transform_0, window_bounds = array<i64: 8, 32>}, {transform_indices = @transform_1, window_bounds = array<i64: 8, 1>}, {transform_indices = @transform_2, window_bounds = array<i64: 1, 1>}]} {
    %c0 = arith.constant 0 : index
    %c0_0 = arith.constant 0 : index
    %0 = vector.load %arg1[%c0, %c0_0] : memref<8x32xf32, #tpu.memory_space<vmem>>, vector<8x32xf32>
    %c0_1 = arith.constant 0 : index
    %c0_2 = arith.constant 0 : index
    %1 = vector.load %arg2[%c0_1, %c0_2] : memref<8x1xi32, #tpu.memory_space<vmem>>, vector<8x1xi32>
    %cst = arith.constant dense<0xFF800000> : vector<8xf32>
    %2 = vector.multi_reduction <maximumf>, %0, %cst [1] : vector<8x32xf32> to vector<8xf32>
    %3 = vector.shape_cast %2 : vector<8xf32> to vector<8x1xf32>
    %4 = vector.broadcast %3 : vector<8x1xf32> to vector<8x32xf32>
    %5 = arith.subf %0, %4 : vector<8x32xf32>
    %6 = math.exp %5 : vector<8x32xf32>
    %cst_3 = arith.constant dense<0.000000e+00> : vector<8xf32>
    %7 = vector.multi_reduction <add>, %6, %cst_3 [1] : vector<8x32xf32> to vector<8xf32>
    %8 = vector.shape_cast %7 : vector<8xf32> to vector<8x1xf32>
    %9 = math.log %8 : vector<8x1xf32>
    %10 = arith.addf %3, %9 : vector<8x1xf32>
    %11 = tpu.iota {dimensions = array<i32: 1>} : vector<8x32xi32>
    %12 = vector.broadcast %1 : vector<8x1xi32> to vector<8x32xi32>
    %13 = arith.cmpi eq, %11, %12 : vector<8x32xi32>
    %cst_4 = arith.constant 0.990312516 : f32
    %cst_5 = arith.constant 3.125000e-04 : f32
    %14 = vector.broadcast %cst_4 : f32 to vector<8x32xf32>
    %15 = vector.broadcast %cst_5 : f32 to vector<8x32xf32>
    %16 = arith.select %13, %14, %15 : vector<8x32xi1>, vector<8x32xf32>
    %17 = arith.mulf %16, %0 : vector<8x32xf32>
    %cst_6 = arith.constant dense<0.000000e+00> : vector<8xf32>
    %18 = vector.multi_reduction <add>, %17, %cst_6 [1] : vector<8x32xf32> to vector<8xf32>
    %19 = vector.shape_cast %18 : vector<8xf32> to vector<8x1xf32>
    %20 = arith.subf %10, %19 : vector<8x1xf32>
    %21 = tpu.iota {dimensions = array<i32: 0>} : vector<8x1xi32>
    %c8_i32 = arith.constant 8 : i32
    %22 = arith.muli %arg0, %c8_i32 : i32
    %23 = vector.broadcast %22 : i32 to vector<8x1xi32>
    %24 = arith.addi %21, %23 : vector<8x1xi32>
    %c8_i32_7 = arith.constant 8 : i32
    %25 = vector.broadcast %c8_i32_7 : i32 to vector<8x1xi32>
    %26 = arith.cmpi slt, %24, %25 : vector<8x1xi32>
    %cst_8 = arith.constant 0.000000e+00 : f32
    %27 = vector.broadcast %cst_8 : f32 to vector<8x1xf32>
    %28 = arith.select %26, %20, %27 : vector<8x1xi1>, vector<8x1xf32>
    %29 = vector.shape_cast %28 : vector<8x1xf32> to vector<1x8x1xf32>
    %cst_9 = arith.constant dense<0.000000e+00> : vector<1xf32>
    %30 = vector.multi_reduction <add>, %29, %cst_9 [1, 2] : vector<1x8x1xf32> to vector<1xf32>
    %31 = vector.shape_cast %30 : vector<1xf32> to vector<1x1x1xf32>
    %32 = vector.extract %31[0, 0, 0] : f32 from vector<1x1x1xf32>
    %33 = vector.broadcast %32 : f32 to vector<1x1xf32>
    %c0_10 = arith.constant 0 : index
    %c0_11 = arith.constant 0 : index
    %34 = vector.load %arg3[%c0_10, %c0_11] : memref<1x1xf32, #tpu.memory_space<vmem>>, vector<1x1xf32>
    tpu.vector_store %arg3[%c0_10, %c0_11], %33 {strides = array<i32>} : memref<1x1xf32, #tpu.memory_space<vmem>>, vector<1x1xf32>,
    return
  }
  func.func @transform_0(%arg0: i32) -> (i32, i32) {
    %c0_i32 = arith.constant 0 : i32
    %c0_i32_0 = arith.constant 0 : i32
    return %arg0, %c0_i32 : i32, i32
  }
  func.func @transform_1(%arg0: i32) -> (i32, i32) {
    %c0_i32 = arith.constant 0 : i32
    %c0_i32_0 = arith.constant 0 : i32
    return %arg0, %c0_i32 : i32, i32
  }
  func.func @transform_2(%arg0: i32) -> (i32, i32) {
    %c0_i32 = arith.constant 0 : i32
    %c0_i32_0 = arith.constant 0 : i32
    return %arg0, %c0_i32 : i32, i32
  }
}

</mosaic_0001>

<bundles_post_ra>
// kernel: tpu_custom_call.1
= control target key start
LH: loop header
LB: loop body
LE: loop exit
PB: predicated region body
PF: predicated region fallthrough
CT: control target
= control target key end

     0   :  { %vm14_vm0 = vcmask 261120   ;;  %s147_s0 = inlined_call_operand.vmem [shape: f32[8,32], index: 0, kind: input, shape index: {}]   ;;  %s148_s1 = inlined_call_operand.vmem [shape: s32[8,1], index: 1, kind: input, shape index: {}]   ;;  %s149_s2 = inlined_call_operand.hbm [shape: f32[1,1], index: 2, kind: output, shape index: {}]  }
   0x1   :  { %v12_v0 = vld [vmem:[%s147_s0] sm:$0xff] }
   0x2   :  { %7 = vsyncpa [#allocation3], 0  ;;  %v15_v1 = vsel %vm14_vm0, %v12_v0, -inf  ;;  %v108_v2 = vmov 0   ;;  %v13_v3 = vld [vmem:[%s148_s1] sm:$0xff]  ;;  %v27_v6 = vlaneseq  ;;  %vm46_vm2 = vcmask 7168  }
   0x3   :  { %79 = vset.pattern.permute.xlu0 %v108_v2  ;;  %v109_v10 = vmov 0.0003125   ;;  %s110_s0 = smov [#allocation2]   ;;  %vm58_vm3 = vcmask 0  }
   0x4   :  { %16 = vmax.xlane.f32.xlu0 %v15_v1  ;;  %v28_v8 = vand.u32 127, %v27_v6  ;;  %s66_s1 = sshll.u32 %s110_s0, 4  ;;  %s67_s1 = int_to_ptr.vmem [resolvable:$true] %s66_s1 }
   0x5   :  { %s84_s14 = scalar_lea.vmem %s67_s1, 16  ;;  %s88_s15 = scalar_lea.vmem %s67_s1, 32 }
   0x6   :  { %p85_p0 = scmp.ne.s32.totalorder %s67_s1, %s84_s14  ;;  %p89_p1 = scmp.lt.s32.totalorder %s67_s1, %s67_s1 }
   0x7   :  { %p90_p2 = scmp.lt.s32.totalorder %s88_s15, %s84_s14 }
   0x9   :  { %p91_p3 = por %p90_p2, %p89_p1 }
   0xb   :  { %p92_p4 = pnand %p91_p3, %p85_p0 }
  0x1a   :  { %30 = vperm.xlu0 %79, %v13_v3  }
  0x91   :  { %v17_v4 = vpop.xlane.xlu0 %16 }
  0x92   :  { %v18_v5 = vsub.f32 %v12_v0, %v17_v4 }
  0x94   :  { %v19_v7 = vmul.f32 1.442695, %v18_v5 }
  0x96   :  { %80 = vpow2.f32 %v19_v7 }
  0x99   :  { %v31_v9 = vpop.permute.xlu0 %30 }
  0x9a   :  { %vm32_vm1 = vcmp.eq.s32.totalorder %v28_v8, %v31_v9 }
  0x9b   :  { %v33_v11 = vsel %vm32_vm1, 0.9903125, %v109_v10 }
  0x9c   :  { %v34_v12 = vmul.f32 %v33_v11, %v12_v0 }
  0x9e   :  { %v35_v15 = vsel %vm14_vm0, %v34_v12, 0.0 }
  0xa0   :  { %v81_v13 = vpop.eup %80 }
  0xa1   :  { %v21_v14 = vsel %vm14_vm0, %v81_v13, 0.0 }
  0xa2   :  { %22 = vadd.xlane.f32.xlu1 %v21_v14 }
  0xa6   :  { %36 = vadd.xlane.f32.xlu1 %v35_v15 }
 0x12f   :  { %v23_v16 = vpop.xlane.xlu1 %22 }
 0x130   :  { %82 = vlog2.f32 %v23_v16 }
 0x133   :  { %v37_v19 = vpop.xlane.xlu1 %36 }
 0x13a   :  { %v83_v17 = vpop.eup %82 }
 0x13b   :  { %v25_v18 = vmul.f32 0.6931472, %v83_v17 }
 0x13d   :  { %v26_v20 = vadd.f32 %v25_v18, %v17_v4 }
 0x13f   :  { %v38_v21 = vsub.f32 %v26_v20, %v37_v19 }
 0x141   :  { %v47_v22 = vsel %vm46_vm2, %v38_v21, 0.0 }
 0x142   :  { %48 = vadd.xlane.f32.xlu1 %v47_v22 }
 0x1cf   :  { %v49_v23 = vpop.xlane.xlu1 %48 }
 0x1d0   :  { %v50_v24 = vrot.slane %v49_v23, 4 }
 0x1d2   :  { %v51_v25 = vadd.f32 %v50_v24, %v49_v23 }
 0x1d4   :  { %v52_v26 = vrot.slane %v51_v25, 2 }
 0x1d6   :  { %v53_v27 = vadd.f32 %v52_v26, %v51_v25 }
 0x1d8   :  { %v54_v28 = vrot.slane %v53_v27, 1 }
 0x1da   :  { %v55_v29 = vadd.f32 %v54_v28, %v53_v27 }
 0x1dc   :  { %74 = vpush %v55_v29 }
 0x20d   :  { %s75_s13 = spop %74 }
 0x20e   :  { %v57_v30 = vstv %s75_s13 }
 0x20f   :  { %59 = vst.msk [vmem:[#allocation2] sm:$0x1] %vm58_vm3, %v57_v30 }
 0x210   :  { %95 = shalt.err (!%p92_p4)
}
 0x211   :  { %s96_s18 = scalar_lea.hbm %s149_s2, 16 }
 0x212   :  { %p97_p5 = scmp.ne.s32.totalorder %s149_s2, %s96_s18  ;;  %p100_p6 = scmp.lt.u32.totalorder %s96_s18, %s149_s2 }
 0x214   :  { %p102_p7 = pnand %p100_p6, %p97_p5 }
 0x216   :  { %105 = shalt.err (!%p102_p7)
}
 0x217   :  { %69 = dma.vmem_to_hbm [thread:$0]  %s67_s1, 16, %s149_s2, [#allocation3]  }
 0x218   :  { %106 = dma.done.wait [#allocation3], 16  }
 0x219   :  { %107 = vsyncadd [#allocation3], 4294967280 }
 0x21a   :  { %73 = vsyncpa [#allocation3], 1 }

</bundles_post_ra>
